<compile_context>
chip_gen: v5e
topology: v5e:2x2
jax: 0.10.0
libtpu: 0.0.40
codegen_flags: <defaults>
</compile_context>

<pallas_src>
import jax
import jax.numpy as jnp
from jax.experimental import pallas as pl
from jax.experimental.pallas import tpu as pltpu

_LANE = 128
# Per-grid-step VMEM cap for (in + out), each double-buffered (v7x-safe).
_VMEM_TILE_BUDGET = 24 * 1024 * 1024
# Above this footprint we lift v5e's 16 MiB default scoped-VMEM limit.
_V5E_SCOPED_VMEM_HEADROOM = 14 * 1024 * 1024
# Below this total input size the pallas_call launch overhead dominates.
_MIN_PALLAS_BYTES = 256 * 1024


# ---------------------------------------------------------------------------
# Kernel: broadcast-add a (1, W) embedding row onto a (tr, W) block.
# Pure vld + vadd + vst stream; binding resource is HBM DMA.
# ---------------------------------------------------------------------------
def _box_add_kernel(pts_ref, embed_ref, out_ref):
    out_ref[...] = pts_ref[...] + embed_ref[...]


def _sublane_rows(dtype):
    # Native packed sublane tile: 8 rows (4-byte), 16 (2-byte), 32 (1-byte).
    return max(8, 32 // jnp.dtype(dtype).itemsize)


def _choose_tile_rows(R, W, dtype, tile_rows):
    sub = _sublane_rows(dtype)
    itemsize = jnp.dtype(dtype).itemsize
    # 4 live (tr, W) buffers per step: in + out, double-buffered.
    tr_cap = _VMEM_TILE_BUDGET // (4 * W * itemsize)
    tr = max(sub, (min(tile_rows, tr_cap) // sub) * sub)
    if R <= tr:
        if R < 2 * sub:
            # Single full-array block (any row count is legal as a full block).
            return R
        # Split into >= 2 grid steps so both v7x TensorCores get work.
        half = -(-R // 2)                      # cdiv(R, 2)
        tr = min((-(-half // sub)) * sub, tr)  # round up to sublane multiple
    return tr


# ---------------------------------------------------------------------------
# Pallas wrapper: (R, W) + (1, W) -> (R, W), row-tiled, parallel grid axis.
# ---------------------------------------------------------------------------
def _box_add(pts2d, embed2d, *, tile_rows=1024):
    R, W = pts2d.shape
    dtype = pts2d.dtype
    itemsize = jnp.dtype(dtype).itemsize

    tr = _choose_tile_rows(R, W, dtype, tile_rows)

    compiler_kwargs = dict(dimension_semantics=("parallel",))
    footprint = 4 * tr * W * itemsize + 2 * W * itemsize
    if footprint > _V5E_SCOPED_VMEM_HEADROOM:
        # Lift v5e's 16 MiB default scoped-VMEM limit; stays under the 32 MiB
        # default scoped limit (and 64 MiB physical) on v6e / v7x.
        compiler_kwargs["vmem_limit_bytes"] = min(footprint + (4 << 20), 30 << 20)

    return pl.pallas_call(
        _box_add_kernel,
        out_shape=jax.ShapeDtypeStruct((R, W), dtype),
        grid=(pl.cdiv(R, tr),),
        in_specs=[
            pl.BlockSpec((tr, W), lambda i: (i, 0)),   # streaming point rows
            pl.BlockSpec((1, W), lambda i: (0, 0)),    # resident embed row
        ],
        out_specs=pl.BlockSpec((tr, W), lambda i: (i, 0)),
        compiler_params=pltpu.CompilerParams(**compiler_kwargs),
    )(pts2d, embed2d)


# ---------------------------------------------------------------------------
# BoxEncoder module (JAX / Pallas)
# ---------------------------------------------------------------------------
class BoxEncoder:
    def __init__(self, output_channels=256, key=None, dtype=jnp.float32):
        if key is None:
            key = jax.random.PRNGKey(0)
        k_tl, k_br = jax.random.split(key, 2)
        # Deterministic synthetic init for nn.Parameter(torch.empty(1, C)).
        self.tl_embed = jax.random.normal(k_tl, (1, output_channels), dtype=dtype)
        self.br_embed = jax.random.normal(k_br, (1, output_channels), dtype=dtype)
        # Hoisted out of __call__: (1, 2F) = [tl | br] row, cached per dtype.
        self._embed2d_base = jnp.concatenate([self.tl_embed, self.br_embed], axis=-1)
        self._embed2d_cache = {jnp.dtype(dtype): self._embed2d_base}

    def _embed2d(self, dtype):
        dt = jnp.dtype(dtype)
        if dt not in self._embed2d_cache:
            self._embed2d_cache[dt] = self._embed2d_base.astype(dt)
        return self._embed2d_cache[dt]

    def __call__(self, posenc_tlbr_points, *, tile_rows=1024):
        """posenc_tlbr_points: (B, N, 2, F) -> (B, 2N, F)."""
        B, N, two, F = posenc_tlbr_points.shape
        assert two == 2, "expected a '2' dim holding top-left / bottom-right points"
        dtype = posenc_tlbr_points.dtype

        if B == 0 or N == 0:
            # N = 0 disables box encoding; preserve the empty shape.
            return jnp.zeros((B, 2 * N, F), dtype=dtype)

        # Lane-dense layout: one row per box, tl|br features concatenated.
        R, W = B * N, 2 * F
        pts2d = posenc_tlbr_points.reshape(R, W)
        embed2d = self._embed2d(dtype)

        total_bytes = R * W * jnp.dtype(dtype).itemsize
        if (W % _LANE != 0) or (total_bytes < _MIN_PALLAS_BYTES):
            # Toy feature widths (masked-store regime) or inputs so small that
            # the pallas_call custom-call boundary costs more than the add.
            out2d = pts2d + embed2d
        else:
            out2d = _box_add(pts2d, embed2d, tile_rows=tile_rows)

        # (B*N, 2F) -> (B, 2N, F) == flatten(1, 2) of (B, N, 2, F).
        return out2d.reshape(B, 2 * N, F)


# ---------------------------------------------------------------------------
# Self-test
# ---------------------------------------------------------------------------
if __name__ == "__main__":
    key = jax.random.PRNGKey(0)
    k_params, k1, k2, k3 = jax.random.split(key, 4)

    def reference(enc, posenc):
        tlbr = jnp.stack([enc.tl_embed[0], enc.br_embed[0]], axis=0).astype(posenc.dtype)
        return (posenc + tlbr).reshape(posenc.shape[0], -1, posenc.shape[-1])

    # --- Pallas path: F=128 -> 256-lane rows, R=600 -> grid of 2 (parallel). ---
    B, N, F = 2, 300, 128
    enc = BoxEncoder(output_channels=F, key=k_params)
    posenc = jax.random.normal(k1, (B, N, 2, F), dtype=jnp.float32)
    out = jax.block_until_ready(enc(posenc))
    assert out.shape == (B, 2 * N, F)
    assert jnp.allclose(out, reference(enc, posenc), atol=1e-6)

    # --- bf16 Pallas path: 16-row sublane tiles, R=1280 -> tiled pipeline. ---
    N_BF = 640
    posenc_bf16 = jax.random.normal(k2, (B, N_BF, 2, F), dtype=jnp.bfloat16)
    out_bf16 = jax.block_until_ready(enc(posenc_bf16))
    assert out_bf16.shape == (B, 2 * N_BF, F)
    assert jnp.allclose(
        out_bf16.astype(jnp.float32),
        reference(enc, posenc_bf16).astype(jnp.float32),
        atol=1e-2,
    )

    # --- small / narrow-F input: plain-jnp fallback path. ---
    enc_small = BoxEncoder(output_channels=32, key=k_params)
    posenc_small = jax.random.normal(k3, (2, 4, 2, 32), dtype=jnp.float32)
    out_small = jax.block_until_ready(enc_small(posenc_small))
    assert out_small.shape == (2, 8, 32)
    assert jnp.allclose(out_small, reference(enc_small, posenc_small), atol=1e-6)

    # --- N = 0 disables box encoding. ---
    empty = enc(jnp.zeros((B, 0, 2, F), dtype=jnp.float32))
    assert empty.shape == (B, 0, F)

    print("KERNEL_OK")
</pallas_src>

<mosaic_0001>
module attributes {stable_mosaic.version = 11 : i64} {
  func.func @_box_add_kernel(%arg0: i32, %arg1: memref<304x256xf32, #tpu.memory_space<vmem>>, %arg2: memref<1x256xf32, #tpu.memory_space<vmem>>, %arg3: memref<304x256xf32, #tpu.memory_space<vmem>>) attributes {dimension_semantics = [#tpu.dimension_semantics<parallel>], iteration_bounds = array<i64: 2>, scalar_prefetch = 0 : i64, scratch_operands = 0 : i64, tpu.core_type = #tpu.core_type<tc>, window_params = [{transform_indices = @transform_0, window_bounds = array<i64: 304, 256>}, {pipeline_mode = #tpu.pipeline_mode<synchronous>, transform_indices = @transform_1, window_bounds = array<i64: 1, 256>}, {transform_indices = @transform_2, window_bounds = array<i64: 304, 256>}]} {
    %c0 = arith.constant 0 : index
    %c0_0 = arith.constant 0 : index
    %0 = vector.load %arg1[%c0, %c0_0] : memref<304x256xf32, #tpu.memory_space<vmem>>, vector<304x256xf32>
    %c0_1 = arith.constant 0 : index
    %c0_2 = arith.constant 0 : index
    %1 = vector.load %arg2[%c0_1, %c0_2] : memref<1x256xf32, #tpu.memory_space<vmem>>, vector<1x256xf32>
    %2 = vector.broadcast %1 : vector<1x256xf32> to vector<304x256xf32>
    %3 = arith.addf %0, %2 : vector<304x256xf32>
    %c0_3 = arith.constant 0 : index
    %c0_4 = arith.constant 0 : index
    %4 = vector.load %arg3[%c0_3, %c0_4] : memref<304x256xf32, #tpu.memory_space<vmem>>, vector<304x256xf32>
    tpu.vector_store %arg3[%c0_3, %c0_4], %3 {strides = array<i32>} : memref<304x256xf32, #tpu.memory_space<vmem>>, vector<304x256xf32>,
    return
  }
  func.func @transform_0(%arg0: i32) -> (i32, i32) {
    %c0_i32 = arith.constant 0 : i32
    %c0_i32_0 = arith.constant 0 : i32
    return %arg0, %c0_i32 : i32, i32
  }
  func.func @transform_1(%arg0: i32) -> (i32, i32) {
    %c0_i32 = arith.constant 0 : i32
    %c0_i32_0 = arith.constant 0 : i32
    %c0_i32_1 = arith.constant 0 : i32
    return %c0_i32, %c0_i32_0 : i32, i32
  }
  func.func @transform_2(%arg0: i32) -> (i32, i32) {
    %c0_i32 = arith.constant 0 : i32
    %c0_i32_0 = arith.constant 0 : i32
    return %arg0, %c0_i32 : i32, i32
  }
}

</mosaic_0001>

<bundles_post_ra>
// kernel: tpu_custom_call.1
= control target key start
LH: loop header
LB: loop body
LE: loop exit
PB: predicated region body
PF: predicated region fallthrough
CT: control target
= control target key end

     0   :  { %7 = vsyncpa [#allocation3], 0  ;;  %s1237_s0 = inlined_call_operand.hbm [shape: f32[600,256], index: 0, kind: input, shape index: {}]   ;;  %s1238_s1 = inlined_call_operand.hbm [shape: f32[1,256], index: 1, kind: input, shape index: {}]   ;;  %s1239_s2 = inlined_call_operand.hbm [shape: f32[600,256], index: 2, kind: output, shape index: {}]  }
   0x1   :  { %9 = vsyncpa [#allocation3 + $0x1], 0 }
   0x2   :  { %10 = vsyncpa [#allocation6], 0 }
   0x3   :  { %11 = vsyncpa [#allocation4], 0 }
   0x4   :  { %13 = vsyncpa [#allocation4 + $0x1], 0  ;;  %s802_s9 = smov 0   ;;  %s804_s10 = smov 0  }
   0x5   :  { %s806_s11 = smov 0   ;;  %s808_s12 = smov 0  }
   0x6 LB: > { %s823_s13 = sadd.s32 4294967295, %s778_s12   ;;  %s542_s14 = sadd.s32 4294967294, %s778_s12   ;;  %s778_s12 = sphi %s808_s12, %s1256_s12   ;;  %s774_s11 = sphi %s806_s11, %s1255_s11   ;;  %s770_s10 = sphi %s804_s10, %s1254_s10   ;;  %s766_s9 = sphi %s802_s9, %s1253_s9  }
   0x7   : > { %s827_s15 = sadd.s32 1, %s778_s12   ;;  %s26_s16 = sadd.s32 1, %s774_s11 }
   0x8   : > { %s23_s17 = ssub.s32 %s778_s12, %s827_s15  ;;  %p33_p0 = scmp.ne.s32.totalorder %s774_s11, %s770_s10 }
   0x9   : > { %p24_p1 = scmp.eq.s32.totalorder %s23_s17, 0  ;;  %p34_p2 = scmp.eq.s32.totalorder %s778_s12, 0 }
   0xa   : > { %p39_p3 = scmp.ne.s32.totalorder %s770_s10, %s766_s9  ;;  %p1241_p4 = scmp.eq.s32.totalorder %s823_s13, 0 }
   0xb   : > { %s839_s18 = scalar_select %p24_p1, %s774_s11, %s26_s16  }
   0xc   : > { %p841_p5 = por %p34_p2, %p33_p0  ;;  %p847_p6 = por %p1241_p4, %p39_p3 }
   0xd   : > { %p84_p7 = scmp.eq.s32.totalorder %s823_s13, 1  ;;  %p90_p8 = scmp.eq.s32.totalorder %s542_s14, 1 }
   0xe   : > { %p543_p9 = scmp.ge.s32.totalorder %s778_s12, 1  ;;  %p97_p10 = scmp.lt.s32.totalorder %s778_s12, 3 }
   0xf   : > { %p854_p11 = por %p84_p7, %p33_p0  ;;  %p858_p12 = por %p90_p8, %p39_p3 }
  0x10   : > { %p862_p13 = pnand %p543_p9, %p97_p10  ;;  %s109_s26 = sshll.u32 %s1238_s1, 4  ;;  %s110_s26 = int_to_ptr.hbm [resolvable:$true] %s109_s26 }
  0x11   : > { %s1245_s22 = scalar_select %p858_p12, 1, 0 }
  0x12   : > { %p580_p1 = pneg %p862_p13  ;;  %s780_s27 = smov [#allocation5]  }
  0x13   : > { %s111_s28 = sshll.u32 %s780_s27, 4  ;;  %p1240_p2 = scmp.ge.s32.totalorder %s778_s12, 2  ;;  %s112_s28 = int_to_ptr.vmem [resolvable:$true] %s111_s28 }
  0x14   : > { %p581_p0 = pnand %p580_p1, %p1241_p4 }
  0x15   : > { %118 = sbr.rel (%p1240_p2) target bundleno = 64 (0x40), region = 20 }
  0x16   : > { %583 = dma.hbm_to_vmem [thread:$0]  (!%p581_p0), %s110_s26, 32, %s112_s28, [#allocation6]  }
  0x1a   : > { %121 = sbr.rel (!%p841_p5) target bundleno = 64 (0x40), region = 24  ;;  %s122_s29 = sand.u32 (%p841_p5), 1, %s774_s11  }
  0x1b   : > { %s127_s30 = smul.u32 (%p841_p5), 38, %s778_s12  ;;  %s883_s8 = scalar_lea.sflag (%p841_p5), [#allocation3], %s122_s29 }
  0x1c   : > { %s572_s3 = smul.u32 (%p841_p5), 608, %s122_s29 }
  0x1d   : > { %s128_s4 = ssub.s32 (%p841_p5), 75, %s127_s30 }
  0x1e   : > { %p129_p3 = scmp.lt.s32.totalorder (%p841_p5), %s128_s4, 38  ;;  %s126_s14 = scalar_lea.vmem (%p841_p5), [#allocation2], %s572_s3 }
  0x20   : > { %s1258_s4 = smov (!%p129_p3, %s128_s4), 38 }
  0x21   : > { %s564_s5 = sshll.u32 %s1258_s4, 4 }
  0x22   : > { %s133_s6 = ssub.s32 608, %s564_s5 }
  0x23   : > { %s134_s7 = sshll.u32 %s133_s6, 4 }
  0x24   : > { %135 = vsyncadd %s883_s8, %s134_s7  ;;  %p886_p5 = scmp.ne.s32.totalorder %s564_s5, 0  ;;  %s570_s17 = smul.u32 608, %s778_s12 }
  0x25   : > { %s891_s19 = sshll.u32 %s126_s14, 4  ;;  %s552_s24 = sshll.u32 %s1258_s4, 8  ;;  %s144_s19 = int_to_ptr.vmem [resolvable:$true] %s891_s19 }
  0x26   : > { %s139_s27 = scalar_lea.hbm %s1237_s0, %s570_s17  ;;  %s660_s30 = sshrl.u32 %s552_s24, 4 }
  0x27   : > { %s141_s28 = sshll.u32 %s139_s27, 4  ;;  %s669_s7 = scalar_lea.hbm %s1237_s0, 1200  ;;  %s898_s28 = int_to_ptr.hbm [resolvable:$true] %s141_s28 }
  0x28   : > { %s658_s29 = sshra.s32 %s898_s28, 4  ;;  %s659_s29 = int_to_ptr.hbm [resolvable:$true] %s658_s29 }
  0x29   : > { %s665_s3 = scalar_lea.hbm %s659_s29, %s660_s30  ;;  %p670_p10 = scmp.lt.s32.totalorder %s659_s29, %s1237_s0 }
  0x2a   : > { %p666_p7 = scmp.ne.s32.totalorder %s659_s29, %s665_s3  ;;  %p671_p1 = scmp.lt.s32.totalorder %s669_s7, %s665_s3 }
  0x2c   : > { %p667_p8 = pnand %p666_p7, %p886_p5  ;;  %p672_p0 = por %p671_p1, %p670_p10 }
  0x2e   : > { %p668_p9 = pneg %p667_p8 }
  0x30   : > { %p673_p3 = pnand %p672_p0, %p668_p9 }
  0x32   : > { %676 = shalt.err (!%p673_p3)
}
  0x33   : > { %s677_s25 = sshra.s32 %s144_s19, 4  ;;  %s781_s27 = smov [#allocation2]   ;;  %s678_s25 = int_to_ptr.vmem [resolvable:$true] %s677_s25 }
  0x34   : > { %s684_s26 = scalar_lea.vmem %s678_s25, %s660_s30  ;;  %s688_s5 = scalar_lea.vmem %s781_s27, 1216 }
  0x35   : > { %p685_p7 = scmp.ne.s32.totalorder %s678_s25, %s684_s26  ;;  %p690_p4 = scmp.lt.s32.totalorder %s688_s5, %s684_s26 }
  0x37   : > { %p686_p8 = pnand %p685_p7, %p886_p5 }
  0x39   : > { %p687_p2 = pneg %p686_p8 }
  0x3b   : > { %p692_p12 = pnand %p690_p4, %p687_p2 }
  0x3d   : > { %695 = shalt.err (!%p692_p12)
}
  0x3e   : > { %s782_s29 = smov 256   ;;  %s783_s3 = smov 16  }
  0x3f   : > { %149 = dma.hbm_to_vmem [thread:$0]  (%p886_p5), %s898_s28, %s552_s24, %s144_s19, %s883_s8, %s782_s29, %s782_s29, %s783_s3  }
  0x40 PF: > { %155 = sbr.rel (%p862_p13) target bundleno = 186 (0xba), region = 28  ;;  %s926_s30 = sand.u32 (!%p862_p13), 1, %s770_s10  }
  0x41   : > { %s573_s6 = smul.u32 (!%p862_p13), 608, %s926_s30  ;;  %s158_s7 = scalar_lea.sflag (!%p862_p13), [#allocation3], %s926_s30 }
  0x43   : > { %s930_s14 = scalar_lea.vmem (!%p862_p13), [#allocation2], %s573_s6 }
  0x45   : > { %753 = dma.done.wait (%p847_p6), %s158_s7, 9728  }
  0x46   : > { %755 = vsyncadd (%p847_p6), %s158_s7, 4294957568  ;;  %p1248_p4 = scmp.eq.s32.totalorder %s823_s13, 0 }
  0x48   : > { %757 = dma.done.wait (%p1248_p4), [#allocation6], 32   ;;  %p1249_p12 = pmov %p1248_p4 }
  0x49   : > { %v200_v0 = vld [vmem:[%s930_s14] sm:$0xff]  ;;  %v201_v2 = vld [vmem:[%s930_s14 + $0x8] sm:$0xff]  ;;  %v202_v5 = vld [vmem:[%s930_s14 + $0x10] sm:$0xff]  ;;  %s955_s20 = scalar_lea.vmem [#allocation7], %s573_s6  ;;  %s435_s23 = scalar_lea.sflag [#allocation4], %s926_s30 }
  0x4a   : > { %759 = vsyncadd (%p1249_p12), [#allocation6], 4294967264  ;;  %v276_v1 = vld [vmem:[#allocation5] sm:$0x3]  ;;  %v203_v6 = vld [vmem:[%s930_s14 + $0x18] sm:$0xff]  ;;  %s442_s4 = smul.u32 (%p854_p11), 38, %s823_s13 }
  0x4b   : > { %v942_v3 = vperm.slane %v276_v1, 0  ;;  %v944_v4 = vperm.slane %v276_v1, 1  ;;  %v204_v7 = vld [vmem:[%s930_s14 + $0x20] sm:$0xff]  ;;  %v205_v11 = vld [vmem:[%s930_s14 + $0x28] sm:$0xff]  ;;  %v206_v13 = vld [vmem:[%s930_s14 + $0x30] sm:$0xff] }
  0x4c   : > { %v207_v15 = vld [vmem:[%s930_s14 + $0x38] sm:$0xff]  ;;  %v208_v17 = vld [vmem:[%s930_s14 + $0x40] sm:$0xff]  ;;  %v209_v19 = vld [vmem:[%s930_s14 + $0x48] sm:$0xff]  ;;  %s443_s8 = ssub.s32 (%p854_p11), 75, %s442_s4 }
  0x4d   : > { %v282_v8 = vadd.f32 %v942_v3, %v200_v0  ;;  %v283_v9 = vadd.f32 %v944_v4, %v201_v2  ;;  %v284_v10 = vadd.f32 %v942_v3, %v202_v5  ;;  %v285_v12 = vadd.f32 %v944_v4, %v203_v6  ;;  %v210_v21 = vld [vmem:[%s930_s14 + $0x50] sm:$0xff]  ;;  %v211_v23 = vld [vmem:[%s930_s14 + $0x58] sm:$0xff]  ;;  %v212_v25 = vld [vmem:[%s930_s14 + $0x60] sm:$0xff]  ;;  %p444_p6 = scmp.lt.s32.totalorder (%p854_p11), %s443_s8, 38 }
  0x4e   : > { %v286_v14 = vadd.f32 %v942_v3, %v204_v7  ;;  %v287_v16 = vadd.f32 %v944_v4, %v205_v11  ;;  %v288_v18 = vadd.f32 %v942_v3, %v206_v13  ;;  %v289_v20 = vadd.f32 %v944_v4, %v207_v15  ;;  %v213_v27 = vld [vmem:[%s930_s14 + $0x68] sm:$0xff]  ;;  %v214_v29 = vld [vmem:[%s930_s14 + $0x70] sm:$0xff]  ;;  %v215_v31 = vld [vmem:[%s930_s14 + $0x78] sm:$0xff] }
  0x4f   : > { %358 = vst [vmem:[%s955_s20] sm:$0xff] %v282_v8  ;;  %v290_v22 = vadd.f32 %v942_v3, %v208_v17  ;;  %v291_v24 = vadd.f32 %v944_v4, %v209_v19  ;;  %v292_v26 = vadd.f32 %v942_v3, %v210_v21  ;;  %v293_v28 = vadd.f32 %v944_v4, %v211_v23  ;;  %v216_v33 = vld [vmem:[%s930_s14 + $0x80] sm:$0xff]  ;;  %v217_v35 = vld [vmem:[%s930_s14 + $0x88] sm:$0xff]  ;;  %v218_v37 = vld [vmem:[%s930_s14 + $0x90] sm:$0xff] }
  0x50   : > { %359 = vst [vmem:[%s955_s20 + $0x8] sm:$0xff] %v283_v9  ;;  %v294_v30 = vadd.f32 %v942_v3, %v212_v25  ;;  %v295_v32 = vadd.f32 %v944_v4, %v213_v27  ;;  %v296_v34 = vadd.f32 %v942_v3, %v214_v29  ;;  %v297_v36 = vadd.f32 %v944_v4, %v215_v31  ;;  %v219_v39 = vld [vmem:[%s930_s14 + $0x98] sm:$0xff]  ;;  %v220_v41 = vld [vmem:[%s930_s14 + $0xa0] sm:$0xff]  ;;  %v221_v43 = vld [vmem:[%s930_s14 + $0xa8] sm:$0xff] }
  0x51   : > { %360 = vst [vmem:[%s955_s20 + $0x10] sm:$0xff] %v284_v10  ;;  %v298_v38 = vadd.f32 %v942_v3, %v216_v33  ;;  %v299_v40 = vadd.f32 %v944_v4, %v217_v35  ;;  %v300_v42 = vadd.f32 %v942_v3, %v218_v37  ;;  %v301_v44 = vadd.f32 %v944_v4, %v219_v39  ;;  %v222_v45 = vld [vmem:[%s930_s14 + $0xb0] sm:$0xff]  ;;  %v223_v47 = vld [vmem:[%s930_s14 + $0xb8] sm:$0xff]  ;;  %v224_v49 = vld [vmem:[%s930_s14 + $0xc0] sm:$0xff] }
  0x52   : > { %361 = vst [vmem:[%s955_s20 + $0x18] sm:$0xff] %v285_v12  ;;  %v302_v46 = vadd.f32 %v942_v3, %v220_v41  ;;  %v303_v48 = vadd.f32 %v944_v4, %v221_v43  ;;  %v304_v50 = vadd.f32 %v942_v3, %v222_v45  ;;  %v225_v51 = vld [vmem:[%s930_s14 + $0xc8] sm:$0xff]  ;;  %v305_v52 = vadd.f32 %v944_v4, %v223_v47  ;;  %v226_v53 = vld [vmem:[%s930_s14 + $0xd0] sm:$0xff]  ;;  %v227_v55 = vld [vmem:[%s930_s14 + $0xd8] sm:$0xff] }
  0x53   : > { %362 = vst [vmem:[%s955_s20 + $0x20] sm:$0xff] %v286_v14  ;;  %v306_v54 = vadd.f32 %v942_v3, %v224_v49  ;;  %v307_v56 = vadd.f32 %v944_v4, %v225_v51  ;;  %v228_v57 = vld [vmem:[%s930_s14 + $0xe0] sm:$0xff]  ;;  %v308_v58 = vadd.f32 %v942_v3, %v226_v53  ;;  %v229_v59 = vld [vmem:[%s930_s14 + $0xe8] sm:$0xff]  ;;  %v309_v60 = vadd.f32 %v944_v4, %v227_v55  ;;  %v230_v61 = vld [vmem:[%s930_s14 + $0xf0] sm:$0xff] }
  0x54   : > { %363 = vst [vmem:[%s955_s20 + $0x28] sm:$0xff] %v287_v16  ;;  %v310_v62 = vadd.f32 %v942_v3, %v228_v57  ;;  %v231_v63 = vld [vmem:[%s930_s14 + $0xf8] sm:$0xff]  ;;  %v311_v0 = vadd.f32 %v944_v4, %v229_v59  ;;  %v232_v1 = vld [vmem:[%s930_s14 + $0x100] sm:$0xff]  ;;  %v312_v2 = vadd.f32 %v942_v3, %v230_v61  ;;  %v233_v5 = vld [vmem:[%s930_s14 + $0x108] sm:$0xff] }
  0x55   : > { %364 = vst [vmem:[%s955_s20 + $0x30] sm:$0xff] %v288_v18  ;;  %v313_v6 = vadd.f32 %v944_v4, %v231_v63  ;;  %v234_v7 = vld [vmem:[%s930_s14 + $0x110] sm:$0xff]  ;;  %v314_v8 = vadd.f32 %v942_v3, %v232_v1  ;;  %v235_v9 = vld [vmem:[%s930_s14 + $0x118] sm:$0xff]  ;;  %v315_v10 = vadd.f32 %v944_v4, %v233_v5  ;;  %v236_v11 = vld [vmem:[%s930_s14 + $0x120] sm:$0xff] }
  0x56   : > { %365 = vst [vmem:[%s955_s20 + $0x38] sm:$0xff] %v289_v20  ;;  %v316_v12 = vadd.f32 %v942_v3, %v234_v7  ;;  %v237_v13 = vld [vmem:[%s930_s14 + $0x128] sm:$0xff]  ;;  %v317_v14 = vadd.f32 %v944_v4, %v235_v9  ;;  %v238_v15 = vld [vmem:[%s930_s14 + $0x130] sm:$0xff]  ;;  %v318_v16 = vadd.f32 %v942_v3, %v236_v11  ;;  %v239_v17 = vld [vmem:[%s930_s14 + $0x138] sm:$0xff] }
  0x57   : > { %366 = vst [vmem:[%s955_s20 + $0x40] sm:$0xff] %v290_v22  ;;  %v319_v18 = vadd.f32 %v944_v4, %v237_v13  ;;  %v240_v19 = vld [vmem:[%s930_s14 + $0x140] sm:$0xff]  ;;  %v320_v20 = vadd.f32 %v942_v3, %v238_v15  ;;  %v241_v21 = vld [vmem:[%s930_s14 + $0x148] sm:$0xff]  ;;  %v321_v22 = vadd.f32 %v944_v4, %v239_v17  ;;  %v242_v23 = vld [vmem:[%s930_s14 + $0x150] sm:$0xff] }
  0x58   : > { %367 = vst [vmem:[%s955_s20 + $0x48] sm:$0xff] %v291_v24  ;;  %v322_v24 = vadd.f32 %v942_v3, %v240_v19  ;;  %v243_v25 = vld [vmem:[%s930_s14 + $0x158] sm:$0xff]  ;;  %v244_v27 = vld [vmem:[%s930_s14 + $0x160] sm:$0xff]  ;;  %v245_v29 = vld [vmem:[%s930_s14 + $0x168] sm:$0xff] }
  0x59   : > { %368 = vst [vmem:[%s955_s20 + $0x50] sm:$0xff] %v292_v26  ;;  %v323_v26 = vadd.f32 %v944_v4, %v241_v21  ;;  %v246_v31 = vld [vmem:[%s930_s14 + $0x170] sm:$0xff]  ;;  %v247_v33 = vld [vmem:[%s930_s14 + $0x178] sm:$0xff]  ;;  %v248_v35 = vld [vmem:[%s930_s14 + $0x180] sm:$0xff] }
  0x5a   : > { %369 = vst [vmem:[%s955_s20 + $0x58] sm:$0xff] %v293_v28  ;;  %v324_v28 = vadd.f32 %v942_v3, %v242_v23  ;;  %v249_v37 = vld [vmem:[%s930_s14 + $0x188] sm:$0xff]  ;;  %v250_v39 = vld [vmem:[%s930_s14 + $0x190] sm:$0xff]  ;;  %v251_v41 = vld [vmem:[%s930_s14 + $0x198] sm:$0xff] }
  0x5b   : > { %370 = vst [vmem:[%s955_s20 + $0x60] sm:$0xff] %v294_v30  ;;  %v325_v30 = vadd.f32 %v944_v4, %v243_v25  ;;  %v252_v43 = vld [vmem:[%s930_s14 + $0x1a0] sm:$0xff]  ;;  %v253_v45 = vld [vmem:[%s930_s14 + $0x1a8] sm:$0xff]  ;;  %v254_v47 = vld [vmem:[%s930_s14 + $0x1b0] sm:$0xff] }
  0x5c   : > { %371 = vst [vmem:[%s955_s20 + $0x68] sm:$0xff] %v295_v32  ;;  %v326_v32 = vadd.f32 %v942_v3, %v244_v27  ;;  %v255_v49 = vld [vmem:[%s930_s14 + $0x1b8] sm:$0xff]  ;;  %v256_v51 = vld [vmem:[%s930_s14 + $0x1c0] sm:$0xff]  ;;  %v257_v53 = vld [vmem:[%s930_s14 + $0x1c8] sm:$0xff] }
  0x5d   : > { %372 = vst [vmem:[%s955_s20 + $0x70] sm:$0xff] %v296_v34  ;;  %v327_v34 = vadd.f32 %v944_v4, %v245_v29  ;;  %v258_v55 = vld [vmem:[%s930_s14 + $0x1d0] sm:$0xff]  ;;  %v259_v57 = vld [vmem:[%s930_s14 + $0x1d8] sm:$0xff]  ;;  %v260_v59 = vld [vmem:[%s930_s14 + $0x1e0] sm:$0xff] }
  0x5e   : > { %373 = vst [vmem:[%s955_s20 + $0x78] sm:$0xff] %v297_v36  ;;  %v328_v36 = vadd.f32 %v942_v3, %v246_v31  ;;  %v261_v61 = vld [vmem:[%s930_s14 + $0x1e8] sm:$0xff]  ;;  %v262_v63 = vld [vmem:[%s930_s14 + $0x1f0] sm:$0xff]  ;;  %v263_v1 = vld [vmem:[%s930_s14 + $0x1f8] sm:$0xff] }
  0x5f   : > { %374 = vst [vmem:[%s955_s20 + $0x80] sm:$0xff] %v298_v38  ;;  %v329_v38 = vadd.f32 %v944_v4, %v247_v33  ;;  %v264_v5 = vld [vmem:[%s930_s14 + $0x200] sm:$0xff]  ;;  %v265_v7 = vld [vmem:[%s930_s14 + $0x208] sm:$0xff]  ;;  %v266_v9 = vld [vmem:[%s930_s14 + $0x210] sm:$0xff] }
  0x60   : > { %375 = vst [vmem:[%s955_s20 + $0x88] sm:$0xff] %v299_v40  ;;  %v330_v40 = vadd.f32 %v942_v3, %v248_v35  ;;  %v267_v11 = vld [vmem:[%s930_s14 + $0x218] sm:$0xff]  ;;  %v268_v13 = vld [vmem:[%s930_s14 + $0x220] sm:$0xff]  ;;  %v269_v15 = vld [vmem:[%s930_s14 + $0x228] sm:$0xff] }
  0x61   : > { %376 = vst [vmem:[%s955_s20 + $0x90] sm:$0xff] %v300_v42  ;;  %v331_v42 = vadd.f32 %v944_v4, %v249_v37  ;;  %v270_v17 = vld [vmem:[%s930_s14 + $0x230] sm:$0xff]  ;;  %v271_v19 = vld [vmem:[%s930_s14 + $0x238] sm:$0xff]  ;;  %v272_v21 = vld [vmem:[%s930_s14 + $0x240] sm:$0xff] }
  0x62   : > { %377 = vst [vmem:[%s955_s20 + $0x98] sm:$0xff] %v301_v44  ;;  %v332_v44 = vadd.f32 %v942_v3, %v250_v39  ;;  %v273_v23 = vld [vmem:[%s930_s14 + $0x248] sm:$0xff]  ;;  %v274_v25 = vld [vmem:[%s930_s14 + $0x250] sm:$0xff]  ;;  %v275_v27 = vld [vmem:[%s930_s14 + $0x258] sm:$0xff] }
  0x63   : > { %378 = vst [vmem:[%s955_s20 + $0xa0] sm:$0xff] %v302_v46  ;;  %v333_v46 = vadd.f32 %v944_v4, %v251_v41  ;;  %v356_v29 = vadd.f32 %v942_v3, %v274_v25 }
  0x64   : > { %379 = vst [vmem:[%s955_s20 + $0xa8] sm:$0xff] %v303_v48  ;;  %v334_v48 = vadd.f32 %v942_v3, %v252_v43 }
  0x65   : > { %380 = vst [vmem:[%s955_s20 + $0xb0] sm:$0xff] %v304_v50  ;;  %v335_v50 = vadd.f32 %v944_v4, %v253_v45 }
  0x66   : > { %381 = vst [vmem:[%s955_s20 + $0xb8] sm:$0xff] %v305_v52  ;;  %v336_v52 = vadd.f32 %v942_v3, %v254_v47 }
  0x67   : > { %382 = vst [vmem:[%s955_s20 + $0xc0] sm:$0xff] %v306_v54  ;;  %v337_v54 = vadd.f32 %v944_v4, %v255_v49 }
  0x68   : > { %383 = vst [vmem:[%s955_s20 + $0xc8] sm:$0xff] %v307_v56  ;;  %v338_v56 = vadd.f32 %v942_v3, %v256_v51 }
  0x69   : > { %384 = vst [vmem:[%s955_s20 + $0xd0] sm:$0xff] %v308_v58  ;;  %v339_v58 = vadd.f32 %v944_v4, %v257_v53 }
  0x6a   : > { %385 = vst [vmem:[%s955_s20 + $0xd8] sm:$0xff] %v309_v60  ;;  %v340_v60 = vadd.f32 %v942_v3, %v258_v55 }
  0x6b   : > { %386 = vst [vmem:[%s955_s20 + $0xe0] sm:$0xff] %v310_v62  ;;  %v341_v62 = vadd.f32 %v944_v4, %v259_v57 }
  0x6c   : > { %387 = vst [vmem:[%s955_s20 + $0xe8] sm:$0xff] %v311_v0  ;;  %v342_v0 = vadd.f32 %v942_v3, %v260_v59 }
  0x6d   : > { %388 = vst [vmem:[%s955_s20 + $0xf0] sm:$0xff] %v312_v2  ;;  %v343_v2 = vadd.f32 %v944_v4, %v261_v61 }
  0x6e   : > { %389 = vst [vmem:[%s955_s20 + $0xf8] sm:$0xff] %v313_v6  ;;  %v344_v6 = vadd.f32 %v942_v3, %v262_v63 }
  0x6f   : > { %390 = vst [vmem:[%s955_s20 + $0x100] sm:$0xff] %v314_v8  ;;  %v345_v8 = vadd.f32 %v944_v4, %v263_v1 }
  0x70   : > { %391 = vst [vmem:[%s955_s20 + $0x108] sm:$0xff] %v315_v10  ;;  %v346_v10 = vadd.f32 %v942_v3, %v264_v5 }
  0x71   : > { %392 = vst [vmem:[%s955_s20 + $0x110] sm:$0xff] %v316_v12  ;;  %v347_v12 = vadd.f32 %v944_v4, %v265_v7 }
  0x72   : > { %393 = vst [vmem:[%s955_s20 + $0x118] sm:$0xff] %v317_v14  ;;  %v348_v14 = vadd.f32 %v942_v3, %v266_v9 }
  0x73   : > { %394 = vst [vmem:[%s955_s20 + $0x120] sm:$0xff] %v318_v16  ;;  %v349_v16 = vadd.f32 %v944_v4, %v267_v11 }
  0x74   : > { %395 = vst [vmem:[%s955_s20 + $0x128] sm:$0xff] %v319_v18  ;;  %v350_v18 = vadd.f32 %v942_v3, %v268_v13 }
  0x75   : > { %396 = vst [vmem:[%s955_s20 + $0x130] sm:$0xff] %v320_v20  ;;  %v351_v20 = vadd.f32 %v944_v4, %v269_v15 }
  0x76   : > { %397 = vst [vmem:[%s955_s20 + $0x138] sm:$0xff] %v321_v22  ;;  %v352_v22 = vadd.f32 %v942_v3, %v270_v17 }
  0x77   : > { %398 = vst [vmem:[%s955_s20 + $0x140] sm:$0xff] %v322_v24  ;;  %v353_v24 = vadd.f32 %v944_v4, %v271_v19 }
  0x78   : > { %399 = vst [vmem:[%s955_s20 + $0x148] sm:$0xff] %v323_v26  ;;  %v354_v26 = vadd.f32 %v942_v3, %v272_v21 }
  0x79   : > { %400 = vst [vmem:[%s955_s20 + $0x150] sm:$0xff] %v324_v28  ;;  %v355_v28 = vadd.f32 %v944_v4, %v273_v23 }
  0x7a   : > { %401 = vst [vmem:[%s955_s20 + $0x158] sm:$0xff] %v325_v30  ;;  %v357_v30 = vadd.f32 %v944_v4, %v275_v27 }
  0x7b   : > { %402 = vst [vmem:[%s955_s20 + $0x160] sm:$0xff] %v326_v32 }
  0x7c   : > { %403 = vst [vmem:[%s955_s20 + $0x168] sm:$0xff] %v327_v34 }
  0x7d   : > { %404 = vst [vmem:[%s955_s20 + $0x170] sm:$0xff] %v328_v36 }
  0x7e   : > { %405 = vst [vmem:[%s955_s20 + $0x178] sm:$0xff] %v329_v38 }
  0x7f   : > { %406 = vst [vmem:[%s955_s20 + $0x180] sm:$0xff] %v330_v40 }
  0x80   : > { %407 = vst [vmem:[%s955_s20 + $0x188] sm:$0xff] %v331_v42 }
  0x81   : > { %408 = vst [vmem:[%s955_s20 + $0x190] sm:$0xff] %v332_v44 }
  0x82   : > { %409 = vst [vmem:[%s955_s20 + $0x198] sm:$0xff] %v333_v46 }
  0x83   : > { %410 = vst [vmem:[%s955_s20 + $0x1a0] sm:$0xff] %v334_v48 }
  0x84   : > { %411 = vst [vmem:[%s955_s20 + $0x1a8] sm:$0xff] %v335_v50 }
  0x85   : > { %412 = vst [vmem:[%s955_s20 + $0x1b0] sm:$0xff] %v336_v52 }
  0x86   : > { %413 = vst [vmem:[%s955_s20 + $0x1b8] sm:$0xff] %v337_v54 }
  0x87   : > { %414 = vst [vmem:[%s955_s20 + $0x1c0] sm:$0xff] %v338_v56 }
  0x88   : > { %415 = vst [vmem:[%s955_s20 + $0x1c8] sm:$0xff] %v339_v58 }
  0x89   : > { %416 = vst [vmem:[%s955_s20 + $0x1d0] sm:$0xff] %v340_v60 }
  0x8a   : > { %417 = vst [vmem:[%s955_s20 + $0x1d8] sm:$0xff] %v341_v62 }
  0x8b   : > { %418 = vst [vmem:[%s955_s20 + $0x1e0] sm:$0xff] %v342_v0 }
  0x8c   : > { %419 = vst [vmem:[%s955_s20 + $0x1e8] sm:$0xff] %v343_v2 }
  0x8d   : > { %420 = vst [vmem:[%s955_s20 + $0x1f0] sm:$0xff] %v344_v6 }
  0x8e   : > { %421 = vst [vmem:[%s955_s20 + $0x1f8] sm:$0xff] %v345_v8 }
  0x8f   : > { %422 = vst [vmem:[%s955_s20 + $0x200] sm:$0xff] %v346_v10 }
  0x90   : > { %423 = vst [vmem:[%s955_s20 + $0x208] sm:$0xff] %v347_v12 }
  0x91   : > { %424 = vst [vmem:[%s955_s20 + $0x210] sm:$0xff] %v348_v14 }
  0x92   : > { %425 = vst [vmem:[%s955_s20 + $0x218] sm:$0xff] %v349_v16 }
  0x93   : > { %426 = vst [vmem:[%s955_s20 + $0x220] sm:$0xff] %v350_v18 }
  0x94   : > { %427 = vst [vmem:[%s955_s20 + $0x228] sm:$0xff] %v351_v20 }
  0x95   : > { %428 = vst [vmem:[%s955_s20 + $0x230] sm:$0xff] %v352_v22 }
  0x96   : > { %429 = vst [vmem:[%s955_s20 + $0x238] sm:$0xff] %v353_v24  ;;  %441 = sbr.rel (!%p854_p11) target bundleno = 186 (0xba), region = 40 }
  0x97   : > { %430 = vst [vmem:[%s955_s20 + $0x240] sm:$0xff] %v354_v26 }
  0x98   : > { %431 = vst [vmem:[%s955_s20 + $0x248] sm:$0xff] %v355_v28 }
  0x99   : > { %432 = vst [vmem:[%s955_s20 + $0x250] sm:$0xff] %v356_v29 }
  0x9a   : > { %433 = vst [vmem:[%s955_s20 + $0x258] sm:$0xff] %v357_v30 }
  0x9b   : > { %s1260_s8 = smov (!%p444_p6, %s443_s8), 38 }
  0x9c   : > { %s567_s16 = sshll.u32 %s1260_s8, 4 }
  0x9d   : > { %s448_s19 = ssub.s32 608, %s567_s16 }
  0x9e   : > { %s449_s24 = sshll.u32 %s448_s19, 4 }
  0x9f   : > { %450 = vsyncadd %s435_s23, %s449_s24  ;;  %p1183_p13 = scmp.ne.s32.totalorder %s567_s16, 0  ;;  %s571_s28 = smul.u32 608, %s823_s13 }
  0xa0   : > { %s456_s17 = sshll.u32 %s955_s20, 4  ;;  %s561_s25 = sshll.u32 %s1260_s8, 8  ;;  %s1193_s17 = int_to_ptr.vmem [resolvable:$true] %s456_s17 }
  0xa1   : > { %s454_s5 = scalar_lea.hbm %s1239_s2, %s571_s28  ;;  %s697_s3 = sshra.s32 %s1193_s17, 4  ;;  %s698_s3 = int_to_ptr.vmem [resolvable:$true] %s697_s3 }
  0xa2   : > { %s458_s29 = sshll.u32 %s454_s5, 4  ;;  %s699_s6 = sshrl.u32 %s561_s25, 4  ;;  %s1195_s29 = int_to_ptr.hbm [resolvable:$true] %s458_s29 }
  0xa3   : > { %s704_s7 = scalar_lea.vmem %s698_s3, %s699_s6  ;;  %s784_s13 = smov [#allocation7]  }
  0xa4   : > { %p705_p11 = scmp.ne.s32.totalorder %s698_s3, %s704_s7  ;;  %s708_s14 = scalar_lea.vmem %s784_s13, 1216 }
  0xa5   : > { %p710_p9 = scmp.lt.s32.totalorder %s708_s14, %s704_s7 }
  0xa6   : > { %p706_p2 = pnand %p705_p11, %p1183_p13 }
  0xa8   : > { %p707_p5 = pneg %p706_p2 }
  0xaa   : > { %p712_p10 = pnand %p710_p9, %p707_p5 }
  0xac   : > { %715 = shalt.err (!%p712_p10)
}
  0xad   : > { %s716_s20 = sshra.s32 %s1195_s29, 4  ;;  %s727_s24 = scalar_lea.hbm %s1239_s2, 1200  ;;  %s717_s20 = int_to_ptr.hbm [resolvable:$true] %s716_s20 }
  0xae   : > { %s723_s4 = scalar_lea.hbm %s717_s20, %s699_s6  ;;  %p728_p7 = scmp.lt.s32.totalorder %s717_s20, %s1239_s2 }
  0xaf   : > { %p724_p1 = scmp.ne.s32.totalorder %s717_s20, %s723_s4  ;;  %p729_p8 = scmp.lt.s32.totalorder %s727_s24, %s723_s4 }
  0xb1   : > { %p725_p0 = pnand %p724_p1, %p1183_p13  ;;  %p730_p4 = por %p729_p8, %p728_p7 }
  0xb3   : > { %p726_p3 = pneg %p725_p0 }
  0xb5   : > { %p731_p12 = pnand %p730_p4, %p726_p3 }
  0xb7   : > { %734 = shalt.err (!%p731_p12)
}
  0xb8   : > { %s785_s27 = smov 256   ;;  %s786_s5 = smov 16  }
  0xb9   : > { %464 = dma.vmem_to_hbm [thread:$0]  (%p1183_p13), %s1193_s17, %s561_s25, %s1195_s29, %s435_s23, %s785_s27, %s785_s27, %s786_s5  }
  0xba PF: > { %s473_s3 = sand.u32 1, %s766_s9   ;;  %p1251_p6 = scmp.ne.s32.totalorder %s1245_s22, 0 }
  0xbb   : > { %p1252_p11 = scmp.ge.s32.totalorder %s778_s12, 2  ;;  %s474_s6 = scalar_lea.sflag [#allocation4], %s473_s3 }
  0xbd   : > { %p585_p2 = pnand %p1252_p11, %p1251_p6 }
  0xbf   : > { %p586_p5 = pneg %p585_p2 }
  0xc1   : > { %761 = dma.done.wait (%p586_p5), %s474_s6, 9728  }
  0xc2   : > { %763 = vsyncadd (%p586_p5), %s474_s6, 4294957568  ;;  %p16_p9 = scmp.ge.s32.totalorder %s827_s15, 4   ;;  %s1253_s9 = smov %s770_s10 }
  0xc3   : > { %s1254_s10 = smov %s774_s11  ;;  %s1255_s11 = smov %s839_s18 }
  0xc4   : > { %s1256_s12 = smov %s827_s15  ;;  %18 = sbr.rel (!%p16_p9) target bundleno = 6 (0x6), region = 77 }
  0xc9   :  { %480 = vsyncpa [#allocation3], 1 }
  0xca   :  { %482 = vsyncpa [#allocation3 + $0x1], 1 }
  0xcb   :  { %483 = vsyncpa [#allocation6], 1 }
  0xcc   :  { %484 = vsyncpa [#allocation4], 1 }
  0xcd   :  { %486 = vsyncpa [#allocation4 + $0x1], 1 }

</bundles_post_ra>
